<compile_context>
chip_gen: v6e
topology: v6e:2x2x1
jax: 0.10.0
libtpu: 0.0.40
codegen_flags: <defaults>
</compile_context>

<pallas_src>
import jax
import jax.numpy as jnp
import numpy as np
from jax.experimental import pallas as pl
from jax.experimental.pallas import tpu as pltpu


def _gcn_layer_kernel(adj_ref, x_ref, w_ref, b_ref, o_ref):
    """One row tile of relu( (D^-1 (A+I) x) @ W^T + b )."""
    i = pl.program_id(0)
    tn = o_ref.shape[0]

    adj = adj_ref[...]                                    # (TN, N) adjacency row tile
    x = x_ref[...]                                        # (N, H)  full feature matrix

    # Rows of x belonging to this tile (the "+ I" contribution of A_hat).
    row0 = pl.multiple_of(i * tn, tn)
    x_rows = x_ref[pl.ds(row0, tn), :]                    # (TN, H)

    # Degree of each row of (A + I): rowsum(adj) + 1.
    deg = jnp.sum(adj, axis=-1, keepdims=True) + 1.0      # (TN, 1)

    # (A + I) @ x for this row tile, then normalize the (TN, H) product
    # (cheaper than normalizing the (TN, N) adjacency tile).
    agg = (jnp.dot(adj, x, preferred_element_type=jnp.float32) + x_rows) / deg

    h = jnp.dot(agg, w_ref[...], preferred_element_type=jnp.float32) + b_ref[...]
    o_ref[...] = jnp.maximum(h, 0.0).astype(o_ref.dtype)


def _gcn_layer(adj, x, w_t, b, *, tile_rows):
    N, H = x.shape
    assert N % tile_rows == 0
    return pl.pallas_call(
        _gcn_layer_kernel,
        out_shape=jax.ShapeDtypeStruct((N, H), jnp.float32),
        grid_spec=pltpu.PrefetchScalarGridSpec(
            num_scalar_prefetch=0,
            grid=(N // tile_rows,),
            in_specs=[
                pl.BlockSpec((tile_rows, N), lambda i: (i, 0)),  # adjacency row tile
                pl.BlockSpec((N, H), lambda i: (0, 0)),          # full features
                pl.BlockSpec((H, H), lambda i: (0, 0)),          # W^T
                pl.BlockSpec((1, H), lambda i: (0, 0)),          # bias
            ],
            out_specs=pl.BlockSpec((tile_rows, H), lambda i: (i, 0)),
        ),
        compiler_params=pltpu.CompilerParams(
            dimension_semantics=("parallel",)),
    )(adj, x, w_t, b)


def merge_forward(tree_embed_mat, a_matrix, w1, b1, w2, b2, *, tile_rows=8):
    """tree_embed_mat: (1, N, H), a_matrix: (N, N),
    w1/w2: (H, H) torch nn.Linear layout, b1/b2: (H,)."""
    x = jnp.asarray(tree_embed_mat, jnp.float32)
    if x.ndim == 3:
        x = x[0]                                          # .squeeze(0)
    adj = jnp.asarray(a_matrix, jnp.float32)
    N, H = x.shape
    # TODO(synk): em_dropout (p=0.5) omitted — identity at inference/eval time.

    w1_t = jnp.asarray(w1, jnp.float32).T                 # (H, H)
    w2_t = jnp.asarray(w2, jnp.float32).T
    b1r = jnp.asarray(b1, jnp.float32).reshape(1, H)
    b2r = jnp.asarray(b2, jnp.float32).reshape(1, H)

    h1 = _gcn_layer(adj, x, w1_t, b1r, tile_rows=tile_rows)
    out = _gcn_layer(adj, h1, w2_t, b2r, tile_rows=tile_rows)
    return out


def _reference(tree_embed_mat, a_matrix, w1, b1, w2, b2):
    # Pure-JAX mirror of the PyTorch forward (eval mode, dropout = identity).
    x = tree_embed_mat[0]
    N = a_matrix.shape[0]
    a_hat = a_matrix + jnp.eye(N, dtype=a_matrix.dtype)
    d = a_hat.sum(1)
    A = jnp.diag(1.0 / d) @ a_hat
    h1 = jax.nn.relu(A @ x @ w1.T + b1)
    return jax.nn.relu(A @ h1 @ w2.T + b2)


if __name__ == "__main__":
    key = jax.random.PRNGKey(0)
    k_x, k_a, k_w1, k_b1, k_w2, k_b2 = jax.random.split(key, 6)

    hidden_size = 32       # H
    embedding_size = 64    # stored by the module but unused in forward
    n_nodes = 16           # N

    tree_embed_mat = jax.random.normal(
        k_x, (1, n_nodes, hidden_size), jnp.float32)
    a_matrix = (jax.random.uniform(k_a, (n_nodes, n_nodes)) > 0.6).astype(
        jnp.float32)

    # nn.Linear(hidden, hidden) parameter shapes.
    w1 = jax.random.normal(k_w1, (hidden_size, hidden_size), jnp.float32) * 0.1
    b1 = jax.random.normal(k_b1, (hidden_size,), jnp.float32) * 0.1
    w2 = jax.random.normal(k_w2, (hidden_size, hidden_size), jnp.float32) * 0.1
    b2 = jax.random.normal(k_b2, (hidden_size,), jnp.float32) * 0.1

    out = merge_forward(tree_embed_mat, a_matrix, w1, b1, w2, b2, tile_rows=8)
    out = jax.block_until_ready(out)

    ref = _reference(tree_embed_mat, a_matrix, w1, b1, w2, b2)
    np.testing.assert_allclose(np.asarray(out), np.asarray(ref),
                               rtol=1e-4, atol=1e-4)
    print("KERNEL_OK")
</pallas_src>

<mosaic_0001>
module attributes {stable_mosaic.version = 11 : i64} {
  func.func @_gcn_layer_kernel(%arg0: i32, %arg1: memref<8x16xf32, #tpu.memory_space<vmem>>, %arg2: memref<16x32xf32, #tpu.memory_space<vmem>>, %arg3: memref<32x32xf32, #tpu.memory_space<vmem>>, %arg4: memref<1x32xf32, #tpu.memory_space<vmem>>, %arg5: memref<8x32xf32, #tpu.memory_space<vmem>>) attributes {dimension_semantics = [#tpu.dimension_semantics<parallel>], iteration_bounds = array<i64: 2>, scalar_prefetch = 0 : i64, scratch_operands = 0 : i64, tpu.core_type = #tpu.core_type<tc>, window_params = [{transform_indices = @transform_0, window_bounds = array<i64: 8, 16>}, {pipeline_mode = #tpu.pipeline_mode<synchronous>, transform_indices = @transform_1, window_bounds = array<i64: 16, 32>}, {pipeline_mode = #tpu.pipeline_mode<synchronous>, transform_indices = @transform_2, window_bounds = array<i64: 32, 32>}, {pipeline_mode = #tpu.pipeline_mode<synchronous>, transform_indices = @transform_3, window_bounds = array<i64: 1, 32>}, {transform_indices = @transform_4, window_bounds = array<i64: 8, 32>}]} {
    %c0 = arith.constant 0 : index
    %c0_0 = arith.constant 0 : index
    %0 = vector.load %arg1[%c0, %c0_0] : memref<8x16xf32, #tpu.memory_space<vmem>>, vector<8x16xf32>
    %c0_1 = arith.constant 0 : index
    %c0_2 = arith.constant 0 : index
    %1 = vector.load %arg2[%c0_1, %c0_2] : memref<16x32xf32, #tpu.memory_space<vmem>>, vector<16x32xf32>
    %c8_i32 = arith.constant 8 : i32
    %2 = arith.muli %arg0, %c8_i32 : i32
    %3 = tpu.assume_multiple %2, 8 : i32
    %4 = arith.index_cast %3 : i32 to index
    %c0_3 = arith.constant 0 : index
    %5 = vector.load %arg2[%4, %c0_3] : memref<16x32xf32, #tpu.memory_space<vmem>>, vector<8x32xf32>
    %cst = arith.constant dense<0.000000e+00> : vector<8xf32>
    %6 = vector.multi_reduction <add>, %0, %cst [1] : vector<8x16xf32> to vector<8xf32>
    %7 = vector.shape_cast %6 : vector<8xf32> to vector<8x1xf32>
    %cst_4 = arith.constant 1.000000e+00 : f32
    %8 = vector.broadcast %cst_4 : f32 to vector<8x1xf32>
    %9 = arith.addf %7, %8 : vector<8x1xf32>
    %cst_5 = arith.constant dense<0.000000e+00> : vector<8x32xf32>
    %10 = tpu.matmul %0, %1, %cst_5 {dimension_numbers = #tpu.dot_dimension_numbers<[1], [0], [0], [1], [0, 0, 1, 1], [], []>} : vector<8x16xf32>, vector<16x32xf32>, vector<8x32xf32> -> vector<8x32xf32>
    %11 = arith.addf %10, %5 : vector<8x32xf32>
    %12 = vector.broadcast %9 : vector<8x1xf32> to vector<8x32xf32>
    %13 = arith.divf %11, %12 : vector<8x32xf32>
    %c0_6 = arith.constant 0 : index
    %c0_7 = arith.constant 0 : index
    %14 = vector.load %arg3[%c0_6, %c0_7] : memref<32x32xf32, #tpu.memory_space<vmem>>, vector<32x32xf32>
    %cst_8 = arith.constant dense<0.000000e+00> : vector<8x32xf32>
    %15 = tpu.matmul %13, %14, %cst_8 {dimension_numbers = #tpu.dot_dimension_numbers<[1], [0], [0], [1], [0, 0, 1, 1], [], []>} : vector<8x32xf32>, vector<32x32xf32>, vector<8x32xf32> -> vector<8x32xf32>
    %c0_9 = arith.constant 0 : index
    %c0_10 = arith.constant 0 : index
    %16 = vector.load %arg4[%c0_9, %c0_10] : memref<1x32xf32, #tpu.memory_space<vmem>>, vector<1x32xf32>
    %17 = vector.broadcast %16 : vector<1x32xf32> to vector<8x32xf32>
    %18 = arith.addf %15, %17 : vector<8x32xf32>
    %cst_11 = arith.constant 0.000000e+00 : f32
    %19 = vector.broadcast %cst_11 : f32 to vector<8x32xf32>
    %20 = arith.maximumf %18, %19 : vector<8x32xf32>
    %c0_12 = arith.constant 0 : index
    %c0_13 = arith.constant 0 : index
    %21 = vector.load %arg5[%c0_12, %c0_13] : memref<8x32xf32, #tpu.memory_space<vmem>>, vector<8x32xf32>
    tpu.vector_store %arg5[%c0_12, %c0_13], %20 {strides = array<i32>} : memref<8x32xf32, #tpu.memory_space<vmem>>, vector<8x32xf32>,
    return
  }
  func.func @transform_0(%arg0: i32) -> (i32, i32) {
    %c0_i32 = arith.constant 0 : i32
    %c0_i32_0 = arith.constant 0 : i32
    return %arg0, %c0_i32 : i32, i32
  }
  func.func @transform_1(%arg0: i32) -> (i32, i32) {
    %c0_i32 = arith.constant 0 : i32
    %c0_i32_0 = arith.constant 0 : i32
    %c0_i32_1 = arith.constant 0 : i32
    return %c0_i32, %c0_i32_0 : i32, i32
  }
  func.func @transform_2(%arg0: i32) -> (i32, i32) {
    %c0_i32 = arith.constant 0 : i32
    %c0_i32_0 = arith.constant 0 : i32
    %c0_i32_1 = arith.constant 0 : i32
    return %c0_i32, %c0_i32_0 : i32, i32
  }
  func.func @transform_3(%arg0: i32) -> (i32, i32) {
    %c0_i32 = arith.constant 0 : i32
    %c0_i32_0 = arith.constant 0 : i32
    %c0_i32_1 = arith.constant 0 : i32
    return %c0_i32, %c0_i32_0 : i32, i32
  }
  func.func @transform_4(%arg0: i32) -> (i32, i32) {
    %c0_i32 = arith.constant 0 : i32
    %c0_i32_0 = arith.constant 0 : i32
    return %arg0, %c0_i32 : i32, i32
  }
}

</mosaic_0001>

<bundles_post_ra>
// kernel: tpu_custom_call.1
= control target key start
LH: loop header
LB: loop body
LE: loop exit
PB: predicated region body
PF: predicated region fallthrough
CT: control target
= control target key end

     0   :  { %9 = vsyncpa [#allocation3], 0  ;;  %s995_s0 = inlined_call_operand.hbm [shape: f32[16,16], index: 0, kind: input, shape index: {}]   ;;  %s996_s1 = inlined_call_operand.hbm [shape: f32[16,32], index: 1, kind: input, shape index: {}]   ;;  %s997_s2 = inlined_call_operand.hbm [shape: f32[32,32], index: 2, kind: input, shape index: {}]   ;;  %s998_s3 = inlined_call_operand.vmem [shape: f32[1,32], index: 3, kind: input, shape index: {}]   ;;  %s999_s4 = inlined_call_operand.hbm [shape: f32[16,32], index: 4, kind: output, shape index: {}]  }
   0x1   :  { %11 = vsyncpa [#allocation3 + $0x1], 0 }
   0x2   :  { %12 = vsyncpa [#allocation6], 0 }
   0x3   :  { %13 = vsyncpa [#allocation4], 0 }
   0x4   :  { %15 = vsyncpa [#allocation4 + $0x1], 0  ;;  %s822_s15 = smov 0   ;;  %s824_s16 = smov 0  }
   0x5   :  { %s826_s17 = smov 0   ;;  %s828_s18 = smov 0  }
   0x6 LB: > { %s843_s19 = sadd.s32 4294967295, %s787_s18   ;;  %s520_s20 = sadd.s32 4294967294, %s787_s18   ;;  %s787_s18 = sphi %s828_s18, %s1021_s18   ;;  %s783_s17 = sphi %s826_s17, %s1020_s17   ;;  %s779_s16 = sphi %s824_s16, %s1019_s16   ;;  %s775_s15 = sphi %s822_s15, %s1018_s15  }
   0x7   : > { %p41_p0 = scmp.ne.s32.totalorder %s779_s16, %s775_s15  ;;  %p1000_p1 = scmp.eq.s32.totalorder %s843_s19, 0 }
   0x8   : > { %p134_p3 = scmp.eq.s32.totalorder %s520_s20, 1  ;;  %p521_p5 = scmp.ge.s32.totalorder %s787_s18, 1 }
   0x9   : > { %p852_p4 = por %p1000_p1, %p41_p0  ;;  %p141_p7 = scmp.lt.s32.totalorder %s787_s18, 3 }
   0xa   : > { %p857_p6 = por %p134_p3, %p41_p0  ;;  %s789_s24 = smov [#allocation5]  }
   0xb   : > { %s1004_s21 = scalar_select %p852_p4, 1, 0 }
   0xc   : > { %s1005_s22 = scalar_select %p857_p6, 1, 0 }
   0xd   : > { %p862_p8 = pnand %p521_p5, %p141_p7  ;;  %s153_s25 = sshll.u32 %s789_s24, 4  ;;  %s154_s25 = int_to_ptr.vmem [resolvable:$true] %s153_s25 }
   0xe   : > { %s790_s27 = smov [#allocation7]   ;;  %s650_s29 = scalar_lea.vmem %s154_s25, 256 }
   0xf   : > { %s1006_s23 = scalar_select %p862_p8, 1, 0 }
  0x10   : > { %p578_p9 = pneg %p862_p8  ;;  %s166_s28 = sshll.u32 %s790_s27, 4  ;;  %s167_s28 = int_to_ptr.vmem [resolvable:$true] %s166_s28 }
  0x11   : > { %p651_p13 = scmp.ne.s32.totalorder %s154_s25, %s650_s29  ;;  %p658_p5 = scmp.lt.s32.totalorder %s154_s25, %s154_s25 }
  0x12   : > { %p871_p11 = pnand %p578_p9, %p1000_p1  ;;  %p659_p7 = scmp.lt.s32.totalorder %s650_s29, %s650_s29 }
  0x14   : > { %p641_p12 = pneg %p871_p11  ;;  %p660_p10 = por %p659_p7, %p658_p5 }
  0x16   : > { %p653_p0 = pnand %p651_p13, %p641_p12 }
  0x18   : > { %p654_p3 = pneg %p653_p0 }
  0x1a   : > { %p661_p9 = pnand %p660_p10, %p654_p3 }
  0x1c   : > { %664 = shalt.err (!%p661_p9)
}
  0x1d   : > { %s791_s30 = smov 128   ;;  %s792_s5 = smov 8  }
  0x1e   : > { %581 = dma.hbm_to_vmem [thread:$0]  (!%p871_p11), %s996_s1, 256, %s154_s25, [#allocation6], %s791_s30, %s791_s30, %s792_s5  }
  0x1f   : > { %s676_s8 = scalar_lea.vmem %s167_s28, 512  ;;  %p684_p2 = scmp.lt.s32.totalorder %s167_s28, %s167_s28 }
  0x20   : > { %p677_p1 = scmp.ne.s32.totalorder %s167_s28, %s676_s8  ;;  %p685_p6 = scmp.lt.s32.totalorder %s676_s8, %s676_s8 }
  0x22   : > { %p679_p13 = pnand %p677_p1, %p641_p12  ;;  %p686_p5 = por %p685_p6, %p684_p2 }
  0x24   : > { %p680_p0 = pneg %p679_p13 }
  0x26   : > { %p687_p10 = pnand %p686_p5, %p680_p0 }
  0x28   : > { %690 = shalt.err (!%p687_p10)
}
  0x29   : > { %584 = dma.hbm_to_vmem [thread:$0]  (!%p871_p11), %s997_s2, 512, %s167_s28, [#allocation6], %s791_s30, %s791_s30, %s792_s5  }
  0x2a   : > { %s894_s11 = sadd.s32 1, %s787_s18   ;;  %s28_s12 = sadd.s32 1, %s783_s17 }
  0x2b   : > { %s25_s13 = ssub.s32 %s787_s18, %s894_s11  ;;  %p35_p1 = scmp.ne.s32.totalorder %s783_s17, %s779_s16 }
  0x2c   : > { %p26_p2 = scmp.eq.s32.totalorder %s25_s13, 0  ;;  %p36_p6 = scmp.eq.s32.totalorder %s787_s18, 0 }
  0x2d   : > { %p1008_p12 = scmp.eq.s32.totalorder %s843_s19, 1  ;;  %p595_p7 = scmp.lt.s32.totalorder %s787_s18, 2 }
  0x2e   : > { %s910_s20 = scalar_select %p26_p2, %s783_s17, %s28_s12  }
  0x2f   : > { %p904_p3 = por %p1008_p12, %p35_p1  ;;  %p37_p9 = por %p36_p6, %p35_p1 }
  0x30   : > { %s183_s24 = sand.u32 1, %s783_s17   ;;  %s526_s26 = sshll.u32 %s787_s18, 7 }
  0x31   : > { %s1009_s14 = scalar_select %p904_p3, 1, 0 }
  0x32   : > { %s525_s25 = sshll.u32 %s183_s24, 3  ;;  %s917_s29 = scalar_lea.hbm %s995_s0, %s526_s26 }
  0x33   : > { %s187_s30 = scalar_lea.vmem [#allocation2], %s525_s25  ;;  %p919_p11 = pnand %p595_p7, %p37_p9 }
  0x34   : > { %s194_s5 = sshll.u32 %s187_s30, 4  ;;  %s184_s7 = scalar_lea.sflag [#allocation3], %s183_s24  ;;  %s195_s5 = int_to_ptr.vmem [resolvable:$true] %s194_s5 }
  0x35   : > { %s691_s8 = scalar_lea.hbm %s917_s29, 128  ;;  %p693_p0 = pneg %p919_p11 }
  0x36   : > { %p692_p13 = scmp.ne.s32.totalorder %s917_s29, %s691_s8  ;;  %s696_s12 = scalar_lea.hbm %s995_s0, 256 }
  0x37   : > { %p697_p1 = scmp.lt.s32.totalorder %s917_s29, %s995_s0  ;;  %p698_p2 = scmp.lt.s32.totalorder %s696_s12, %s691_s8 }
  0x38   : > { %p694_p5 = pnand %p693_p0, %p692_p13 }
  0x39   : > { %p699_p6 = por %p698_p2, %p697_p1 }
  0x3a   : > { %p695_p10 = pneg %p694_p5 }
  0x3c   : > { %p700_p12 = pnand %p699_p6, %p695_p10 }
  0x3e   : > { %703 = shalt.err (!%p700_p12)
}
  0x3f   : > { %s704_s26 = scalar_lea.vmem %s195_s5, 128  ;;  %s793_s24 = smov [#allocation2]  }
  0x40   : > { %p705_p7 = scmp.ne.s32.totalorder %s195_s5, %s704_s26  ;;  %s709_s27 = sshll.u32 %s793_s24, 4  ;;  %s710_s27 = int_to_ptr.vmem [resolvable:$false] %s709_s27 }
  0x41   : > { %s711_s28 = scalar_lea.vmem %s710_s27, 256  ;;  %p712_p13 = scmp.lt.s32.totalorder %s195_s5, %s710_s27 }
  0x42   : > { %p707_p9 = pnand %p705_p7, %p693_p0  ;;  %p713_p5 = scmp.lt.s32.totalorder %s711_s28, %s704_s26 }
  0x44   : > { %p708_p3 = pneg %p707_p9  ;;  %p714_p4 = por %p713_p5, %p712_p13 }
  0x46   : > { %p715_p8 = pnand %p714_p4, %p708_p3 }
  0x48   : > { %718 = shalt.err (!%p715_p8)
}
  0x49   : > { %588 = dma.hbm_to_vmem [thread:$0]  (!%p919_p11), %s917_s29, 128, %s195_s5, %s184_s7  }
  0x4a   : > { %p1011_p10 = scmp.ne.s32.totalorder %s1006_s23, 0 }
  0x4b   : > { %s940_s30 = sand.u32 (!%p1011_p10), 1, %s779_s16   ;;  %p1012_p4 = scmp.ne.s32.totalorder (!%p1011_p10), %s1004_s21, 0 }
  0x4c   : > { %203 = sbr.rel (%p1011_p10) target bundleno = 498 (0x1f2), region = 36  ;;  %s528_s8 = sshll.u32 (!%p1011_p10), %s940_s30, 3 }
  0x4d   : > { %s206_s9 = scalar_lea.sflag (!%p1011_p10), [#allocation3], %s940_s30  ;;  %s209_s10 = scalar_lea.vmem (!%p1011_p10), [#allocation2], %s528_s8 }
  0x51   : > { %762 = dma.done.wait (%p1012_p4), %s206_s9, 128  }
  0x52   : > { %764 = vsyncadd (%p1012_p4), %s206_s9, 4294967168  ;;  %p1013_p8 = scmp.eq.s32.totalorder %s843_s19, 0 }
  0x54   : > { %766 = dma.done.wait (%p1013_p8), [#allocation6], 768   ;;  %p1014_p3 = pmov %p1013_p8 }
  0x55   : > { %v794_v0 = vmov 0.0   ;;  %vm795_vm0 = vmmov 0   ;;  %v244_v1 = vld [vmem:[#allocation5 + $0x8] sm:$0xff]  ;;  %v243_v2 = vld [vmem:[#allocation5] sm:$0xff]  ;;  %v242_v3 = vld [vmem:[%s209_s10] sm:$0xff]  ;;  %vm248_vm1 = vcmask 130048  }
  0x56   : > { %768 = vsyncadd (%p1014_p3), [#allocation6], 4294966528  ;;  %548 = vmatprep.subr.mxu0 %v794_v0  ;;  %552 = vmatprep.mubr.msk.f32.mxu0 %vm795_vm0, %v794_v0  ;;  %v249_v4 = vsel %vm248_vm1, %v242_v3, 0.0  ;;  %v331_v5 = vld [vmem:[#allocation7 + $0x18] sm:$0xff]  ;;  %v330_v6 = vld [vmem:[#allocation7 + $0x10] sm:$0xff]  ;;  %s532_s21 = sshll.u32 %s843_s19, 3 }
  0x57   : > { %555 = vmatprep.subr.mxu1 %v794_v0  ;;  %563 = vmatprep.mubr.msk.f32.mxu1 %vm795_vm0, %v794_v0  ;;  %v329_v7 = vld [vmem:[#allocation7 + $0x8] sm:$0xff]  ;;  %v328_v8 = vld [vmem:[#allocation7] sm:$0xff]  ;;  %s246_s23 = scalar_lea.vmem [#allocation5], %s532_s21  ;;  %vm339_vm2 = vcmask 261120   ;;  %s537_s6 = sshll.u32 %s843_s19, 7 }
  0x58   : > { %549 = vmatpush3.msra.mxu0 %v244_v1  ;;  %250 = vadd.xlane.f32.xlu0 %v249_v4  ;;  %v247_v11 = vld [vmem:[%s246_s23] sm:$0xff]  ;;  %s241_s7 = scalar_lea.vmem [#allocation8], %s528_s8  ;;  %s427_s26 = scalar_lea.hbm %s999_s4, %s537_s6 }
  0x59   : > { %550 = vmatprep.subr.mxu0 %v794_v0  ;;  %556 = vmatpush3.msra.mxu1 %v331_v5  ;;  %v534_v17 = vld [vmem:[%s998_s3] ss:$0 sm:$0xff]  ;;  %s429_s12 = sshll.u32 %s241_s7, 4  ;;  %s416_s24 = scalar_lea.sflag [#allocation4], %s940_s30  ;;  %s430_s12 = int_to_ptr.vmem [resolvable:$true] %s429_s12 }
  0x5a   : > { %551 = vmatpush3.msra.mxu0 %v243_v2  ;;  %557 = vmatprep.subr.mxu1 %v794_v0  ;;  %s719_s27 = scalar_lea.vmem %s430_s12, 128  ;;  %p1015_p0 = scmp.ne.s32.totalorder %s1009_s14, 0 }
  0x5b   : > { %553 = vmatmul.mubr.msk.f32.vlgmr.msra.gmra.mxu0 %vm248_vm1, %v242_v3  ;;  %558 = vmatpush3.msra.mxu1 %v330_v6  ;;  %p720_p11 = scmp.ne.s32.totalorder %s430_s12, %s719_s27  ;;  %s796_s28 = smov [#allocation8]  }
  0x5c   : > { %559 = vmatprep.subr.mxu1 %v794_v0  ;;  %s723_s19 = sshll.u32 %s796_s28, 4  ;;  %s724_s19 = int_to_ptr.vmem [resolvable:$false] %s723_s19 }
  0x5d   : > { %560 = vmatpush3.msra.mxu1 %v329_v7  ;;  %p721_p1 = pnand %p720_p11, %p1015_p0  ;;  %s725_s8 = scalar_lea.vmem %s724_s19, 256 }
  0x5e   : > { %561 = vmatprep.subr.mxu1 %v794_v0  ;;  %p726_p6 = scmp.lt.s32.totalorder %s430_s12, %s724_s19  ;;  %p727_p12 = scmp.lt.s32.totalorder %s725_s8, %s719_s27 }
  0x5f   : > { %562 = vmatpush3.msra.mxu1 %v328_v8  ;;  %p722_p2 = pneg %p721_p1 }
  0x60   : > { %p728_p7 = por %p727_p12, %p726_p6 }
  0x62   : > { %p729_p9 = pnand %p728_p7, %p722_p2 }
  0xe1   : > { %v251_v9 = vpop.xlane.xlu0 %250 }
  0xe2   : > { %v252_v10 = vadd.f32 1.0, %v251_v9 }
  0xe4   : > { %637 = vrcp.f32 %v252_v10 }
  0xf1   : > { %v638_v12 = vpop.eup %637 }
 0x11b   : > { %v322_v13 = vpop.f32.mrf.mxu0 }
 0x11c   : > { %v323_v14 = vadd.f32 %v322_v13, %v247_v11 }
 0x11d   : > { %v554_v15 = vpop.f32.mrf.mxu0 }
 0x11e   : > { %v327_v16 = vmul.f32 %v638_v12, %v323_v14 }
 0x120   : > { %564 = vmatmul.mubr.msk.f32.vlgmr.msra.gmra.mxu1 %vm339_vm2, %v327_v16 }
 0x1e0   : > { %v409_v18 = vpop.f32.mrf.mxu1 }
 0x1e1   : > { %v410_v19 = vadd.f32 %v534_v17, %v409_v18 }
 0x1e2   : > { %v565_v20 = vpop.f32.mrf.mxu1 }
 0x1e3   : > { %v413_v21 = vmax.f32 %v410_v19, 0.0 }
 0x1e5   : > { %414 = vst.msk [vmem:[%s241_s7] sm:$0xff] %vm339_vm2, %v413_v21 }
 0x1e6   : > { %732 = shalt.err (!%p729_p9)
}
 0x1e7   : > { %s733_s9 = scalar_lea.hbm %s427_s26, 128  ;;  %s737_s21 = scalar_lea.hbm %s999_s4, 256 }
 0x1e8   : > { %p734_p13 = scmp.ne.s32.totalorder %s427_s26, %s733_s9  ;;  %p738_p4 = scmp.lt.s32.totalorder %s427_s26, %s999_s4 }
 0x1e9   : > { %p739_p8 = scmp.lt.s32.totalorder %s737_s21, %s733_s9 }
 0x1ea   : > { %p735_p5 = pnand %p734_p13, %p1015_p0 }
 0x1eb   : > { %p740_p3 = por %p739_p8, %p738_p4 }
 0x1ec   : > { %p736_p10 = pneg %p735_p5 }
 0x1ee   : > { %p741_p11 = pnand %p740_p3, %p736_p10 }
 0x1f0   : > { %744 = shalt.err (!%p741_p11)
}
 0x1f1   : > { %576 = dma.vmem_to_hbm [thread:$0]  (%p1015_p0), %s430_s12, 128, %s427_s26, %s416_s24  }
 0x1f2 PF: > { %s441_s5 = sand.u32 1, %s775_s15   ;;  %p1016_p1 = scmp.ne.s32.totalorder %s1005_s22, 0 }
 0x1f3   : > { %p1017_p2 = scmp.ge.s32.totalorder %s787_s18, 2  ;;  %s442_s6 = scalar_lea.sflag [#allocation4], %s441_s5 }
 0x1f5   : > { %p590_p6 = pnand %p1017_p2, %p1016_p1 }
 0x1f7   : > { %p591_p12 = pneg %p590_p6 }
 0x1f9   : > { %770 = dma.done.wait (%p591_p12), %s442_s6, 128  }
 0x1fa   : > { %772 = vsyncadd (%p591_p12), %s442_s6, 4294967168  ;;  %p18_p7 = scmp.ge.s32.totalorder %s894_s11, 4   ;;  %s1018_s15 = smov %s779_s16 }
 0x1fb   : > { %s1019_s16 = smov %s783_s17  ;;  %s1020_s17 = smov %s910_s20 }
 0x1fc   : > { %s1021_s18 = smov %s894_s11  ;;  %20 = sbr.rel (!%p18_p7) target bundleno = 6 (0x6), region = 90 }
 0x201   :  { %447 = vsyncpa [#allocation3], 1 }
 0x202   :  { %449 = vsyncpa [#allocation3 + $0x1], 1 }
 0x203   :  { %450 = vsyncpa [#allocation6], 1 }
 0x204   :  { %451 = vsyncpa [#allocation4], 1 }
 0x205   :  { %453 = vsyncpa [#allocation4 + $0x1], 1 }

</bundles_post_ra>
